<compile_context>
chip_gen: v6e
topology: v6e:2x2x1
jax: 0.10.0
libtpu: 0.0.40
codegen_flags: <defaults>
</compile_context>

<pallas_src>
import functools

import jax
import jax.numpy as jnp
from jax.experimental import pallas as pl
from jax.experimental.pallas import tpu as pltpu

LAYERS = [2, 40, 40, 1]


def _round_up(x, m):
    return ((x + m - 1) // m) * m


def _choose_block(n, block_n):
    """Pick (blk, n_pad, steps): 128-aligned block, >=2 steps when >=256 rows,
    padding bounded to <128 rows per grid step (not a whole block)."""
    n128 = _round_up(max(n, 1), 128)
    block_n = _round_up(max(block_n, 128), 128)      # guard non-aligned block_n
    min_steps = 2 if n128 >= 256 else 1              # keep both v7x TCs busy
    steps = max(pl.cdiv(n128, block_n), min_steps)
    blk = _round_up(pl.cdiv(n128, steps), 128)
    n_pad = blk * steps
    return blk, n_pad, steps


def dnn_kernel(x_ref, w1_ref, b1_ref, w2_ref, b2_ref, w3_ref, b3_ref, o_ref,
               *, act_dtype):
    # Transposed layout: batch on lanes.  x_ref: (2, blk); weights: (out, in);
    # biases: (out, 1) broadcast across the lane (batch) axis.  Matmuls accumulate
    # in f32; tanh / intermediate activations optionally run in bf16 (act_dtype).
    xt = x_ref[...]
    z1 = jnp.dot(w1_ref[...], xt, preferred_element_type=jnp.float32) + b1_ref[...]
    h1 = jnp.tanh(z1.astype(act_dtype))
    z2 = jnp.dot(w2_ref[...], h1, preferred_element_type=jnp.float32) + b2_ref[...]
    h2 = jnp.tanh(z2.astype(act_dtype))
    o_ref[...] = (
        jnp.dot(w3_ref[...], h2, preferred_element_type=jnp.float32) + b3_ref[...]
    ).astype(o_ref.dtype)


@functools.partial(jax.jit, static_argnames=("block_n", "act_dtype"))
def dnn_forward_t(xt, params, block_n=16384, act_dtype=jnp.float32):
    """Transposed entry point: xt (2, N) float32 -> (1, N) float32.

    params: (w1, b1, w2, b2, w3, b3) with W:(out,in), b:(out,1)."""
    w1, b1, w2, b2, w3, b3 = params
    fin, n = xt.shape
    assert fin == LAYERS[0]

    blk, n_pad, steps = _choose_block(n, block_n)
    # Single pad along the lane axis (no transpose round-trips in the hot path).
    xt_pad = jnp.pad(xt.astype(jnp.float32), ((0, 0), (0, n_pad - n)))

    full = lambda a: pl.BlockSpec(a.shape, lambda i: (0,) * a.ndim)

    out_t = pl.pallas_call(
        functools.partial(dnn_kernel, act_dtype=act_dtype),
        out_shape=jax.ShapeDtypeStruct((LAYERS[-1], n_pad), jnp.float32),
        grid_spec=pltpu.PrefetchScalarGridSpec(
            num_scalar_prefetch=0,
            grid=(steps,),
            in_specs=[
                pl.BlockSpec((fin, blk), lambda i: (0, i)),
                full(w1), full(b1), full(w2), full(b2), full(w3), full(b3),
            ],
            out_specs=pl.BlockSpec((LAYERS[-1], blk), lambda i: (0, i)),
        ),
        compiler_params=pltpu.CompilerParams(
            dimension_semantics=("parallel",),
        ),
    )(xt_pad, w1, b1, w2, b2, w3, b3)

    return out_t[:, :n]


@functools.partial(jax.jit, static_argnames=("block_n", "act_dtype"))
def dnn_forward(x, params, block_n=16384, act_dtype=jnp.float32):
    """PyTorch-module-shaped entry point: x (N, 2) -> (N, 1)."""
    out_t = dnn_forward_t(x.T, params, block_n=block_n, act_dtype=act_dtype)
    return out_t.T


def init_params(key, layers):
    """Deterministic init matching PyTorch: xavier_uniform_ weights, default bias init.

    Weights stored (out_features, in_features), biases (out_features, 1)."""
    params = []
    for i in range(len(layers) - 1):
        fan_in, fan_out = layers[i], layers[i + 1]
        key, kw, kb = jax.random.split(key, 3)
        # Xavier uniform: U(-a, a), a = gain * sqrt(6 / (fan_in + fan_out)), gain = 1
        a = jnp.sqrt(6.0 / (fan_in + fan_out))
        w = jax.random.uniform(kw, (fan_out, fan_in), jnp.float32, -a, a)
        # PyTorch default Linear bias: U(-1/sqrt(fan_in), 1/sqrt(fan_in))
        bb = 1.0 / jnp.sqrt(float(fan_in))
        b = jax.random.uniform(kb, (fan_out, 1), jnp.float32, -bb, bb)
        params.extend([w, b])
    return tuple(params)


def dnn_reference(x, params):
    w1, b1, w2, b2, w3, b3 = params
    h = jnp.tanh(x @ w1.T + b1.T)
    h = jnp.tanh(h @ w2.T + b2.T)
    return h @ w3.T + b3.T


if __name__ == "__main__":
    key = jax.random.PRNGKey(0)
    kx, kp = jax.random.split(key)

    # Collocation-point style input: N points in 2D (like the meshgrid of x, y in the
    # script).  N is deliberately NOT a multiple of 128 to exercise the padded-tail path.
    N = 300
    x = jax.random.uniform(kx, (N, 2), jnp.float32, -1.0, 1.0)

    params = init_params(kp, LAYERS)
    ref = dnn_reference(x, params)

    # 1) Default config ((N,2) -> (N,1), f32 activations).
    out = jax.block_until_ready(dnn_forward(x, params))
    assert out.shape == (N, 1)
    assert jnp.allclose(out, ref, atol=1e-5, rtol=1e-4), "mismatch vs reference (default)"

    # 2) Transposed (lane-dense) entry point — no wrapper transposes.
    out_t = jax.block_until_ready(dnn_forward_t(x.T, params))
    assert out_t.shape == (1, N)
    assert jnp.allclose(out_t.T, ref, atol=1e-5, rtol=1e-4), "mismatch vs reference (transposed)"

    # 3) Small-block config to exercise a multi-step parallel grid (3 steps of 128 rows,
    #    minimal padding thanks to the cdiv-based block sizing).
    out2 = jax.block_until_ready(dnn_forward(x, params, block_n=128))
    assert out2.shape == (N, 1)
    assert jnp.allclose(out2, ref, atol=1e-5, rtol=1e-4), "mismatch vs reference (tiled)"

    # 4) bf16 activation path (EUP-friendly on v6e/v7x); looser tolerance by design.
    out3 = jax.block_until_ready(dnn_forward(x, params, act_dtype=jnp.bfloat16))
    assert out3.shape == (N, 1)
    assert jnp.allclose(out3, ref, atol=5e-2, rtol=0.0), "mismatch vs reference (bf16 act)"

    print("KERNEL_OK")
</pallas_src>

<mosaic_0001>
module attributes {stable_mosaic.version = 11 : i64} {
  func.func @dnn_kernel(%arg0: i32, %arg1: memref<2x256xf32, #tpu.memory_space<vmem>>, %arg2: memref<40x2xf32, #tpu.memory_space<vmem>>, %arg3: memref<40x1xf32, #tpu.memory_space<vmem>>, %arg4: memref<40x40xf32, #tpu.memory_space<vmem>>, %arg5: memref<40x1xf32, #tpu.memory_space<vmem>>, %arg6: memref<1x40xf32, #tpu.memory_space<vmem>>, %arg7: memref<1x1xf32, #tpu.memory_space<vmem>>, %arg8: memref<1x256xf32, #tpu.memory_space<vmem>>) attributes {dimension_semantics = [#tpu.dimension_semantics<parallel>], iteration_bounds = array<i64: 2>, scalar_prefetch = 0 : i64, scratch_operands = 0 : i64, tpu.core_type = #tpu.core_type<tc>, window_params = [{transform_indices = @transform_0, window_bounds = array<i64: 2, 256>}, {pipeline_mode = #tpu.pipeline_mode<synchronous>, transform_indices = @transform_1, window_bounds = array<i64: 40, 2>}, {pipeline_mode = #tpu.pipeline_mode<synchronous>, transform_indices = @transform_2, window_bounds = array<i64: 40, 1>}, {pipeline_mode = #tpu.pipeline_mode<synchronous>, transform_indices = @transform_3, window_bounds = array<i64: 40, 40>}, {pipeline_mode = #tpu.pipeline_mode<synchronous>, transform_indices = @transform_4, window_bounds = array<i64: 40, 1>}, {pipeline_mode = #tpu.pipeline_mode<synchronous>, transform_indices = @transform_5, window_bounds = array<i64: 1, 40>}, {pipeline_mode = #tpu.pipeline_mode<synchronous>, transform_indices = @transform_6, window_bounds = array<i64: 1, 1>}, {transform_indices = @transform_7, window_bounds = array<i64: 1, 256>}]} {
    %c0 = arith.constant 0 : index
    %c0_0 = arith.constant 0 : index
    %0 = vector.load %arg1[%c0, %c0_0] : memref<2x256xf32, #tpu.memory_space<vmem>>, vector<2x256xf32>
    %c0_1 = arith.constant 0 : index
    %c0_2 = arith.constant 0 : index
    %1 = vector.load %arg2[%c0_1, %c0_2] : memref<40x2xf32, #tpu.memory_space<vmem>>, vector<40x2xf32>
    %cst = arith.constant dense<0.000000e+00> : vector<40x256xf32>
    %2 = tpu.matmul %1, %0, %cst {dimension_numbers = #tpu.dot_dimension_numbers<[1], [0], [0], [1], [0, 0, 1, 1], [], []>} : vector<40x2xf32>, vector<2x256xf32>, vector<40x256xf32> -> vector<40x256xf32>
    %c0_3 = arith.constant 0 : index
    %c0_4 = arith.constant 0 : index
    %3 = vector.load %arg3[%c0_3, %c0_4] : memref<40x1xf32, #tpu.memory_space<vmem>>, vector<40x1xf32>
    %4 = vector.broadcast %3 : vector<40x1xf32> to vector<40x256xf32>
    %5 = arith.addf %2, %4 : vector<40x256xf32>
    %6 = math.tanh %5 : vector<40x256xf32>
    %c0_5 = arith.constant 0 : index
    %c0_6 = arith.constant 0 : index
    %7 = vector.load %arg4[%c0_5, %c0_6] : memref<40x40xf32, #tpu.memory_space<vmem>>, vector<40x40xf32>
    %cst_7 = arith.constant dense<0.000000e+00> : vector<40x256xf32>
    %8 = tpu.matmul %7, %6, %cst_7 {dimension_numbers = #tpu.dot_dimension_numbers<[1], [0], [0], [1], [0, 0, 1, 1], [], []>} : vector<40x40xf32>, vector<40x256xf32>, vector<40x256xf32> -> vector<40x256xf32>
    %c0_8 = arith.constant 0 : index
    %c0_9 = arith.constant 0 : index
    %9 = vector.load %arg5[%c0_8, %c0_9] : memref<40x1xf32, #tpu.memory_space<vmem>>, vector<40x1xf32>
    %10 = vector.broadcast %9 : vector<40x1xf32> to vector<40x256xf32>
    %11 = arith.addf %8, %10 : vector<40x256xf32>
    %12 = math.tanh %11 : vector<40x256xf32>
    %c0_10 = arith.constant 0 : index
    %c0_11 = arith.constant 0 : index
    %13 = vector.load %arg6[%c0_10, %c0_11] : memref<1x40xf32, #tpu.memory_space<vmem>>, vector<1x40xf32>
    %cst_12 = arith.constant dense<0.000000e+00> : vector<1x256xf32>
    %14 = tpu.matmul %13, %12, %cst_12 {dimension_numbers = #tpu.dot_dimension_numbers<[1], [0], [0], [1], [0, 0, 1, 1], [], []>} : vector<1x40xf32>, vector<40x256xf32>, vector<1x256xf32> -> vector<1x256xf32>
    %c0_13 = arith.constant 0 : index
    %c0_14 = arith.constant 0 : index
    %15 = vector.load %arg7[%c0_13, %c0_14] : memref<1x1xf32, #tpu.memory_space<vmem>>, vector<1x1xf32>
    %16 = vector.broadcast %15 : vector<1x1xf32> to vector<1x256xf32>
    %17 = arith.addf %14, %16 : vector<1x256xf32>
    %c0_15 = arith.constant 0 : index
    %c0_16 = arith.constant 0 : index
    %18 = vector.load %arg8[%c0_15, %c0_16] : memref<1x256xf32, #tpu.memory_space<vmem>>, vector<1x256xf32>
    tpu.vector_store %arg8[%c0_15, %c0_16], %17 {strides = array<i32>} : memref<1x256xf32, #tpu.memory_space<vmem>>, vector<1x256xf32>,
    return
  }
  func.func @transform_0(%arg0: i32) -> (i32, i32) {
    %c0_i32 = arith.constant 0 : i32
    %c0_i32_0 = arith.constant 0 : i32
    return %c0_i32, %arg0 : i32, i32
  }
  func.func @transform_1(%arg0: i32) -> (i32, i32) {
    %c0_i32 = arith.constant 0 : i32
    %c0_i32_0 = arith.constant 0 : i32
    %c0_i32_1 = arith.constant 0 : i32
    return %c0_i32, %c0_i32_0 : i32, i32
  }
  func.func @transform_2(%arg0: i32) -> (i32, i32) {
    %c0_i32 = arith.constant 0 : i32
    %c0_i32_0 = arith.constant 0 : i32
    %c0_i32_1 = arith.constant 0 : i32
    return %c0_i32, %c0_i32_0 : i32, i32
  }
  func.func @transform_3(%arg0: i32) -> (i32, i32) {
    %c0_i32 = arith.constant 0 : i32
    %c0_i32_0 = arith.constant 0 : i32
    %c0_i32_1 = arith.constant 0 : i32
    return %c0_i32, %c0_i32_0 : i32, i32
  }
  func.func @transform_4(%arg0: i32) -> (i32, i32) {
    %c0_i32 = arith.constant 0 : i32
    %c0_i32_0 = arith.constant 0 : i32
    %c0_i32_1 = arith.constant 0 : i32
    return %c0_i32, %c0_i32_0 : i32, i32
  }
  func.func @transform_5(%arg0: i32) -> (i32, i32) {
    %c0_i32 = arith.constant 0 : i32
    %c0_i32_0 = arith.constant 0 : i32
    %c0_i32_1 = arith.constant 0 : i32
    return %c0_i32, %c0_i32_0 : i32, i32
  }
  func.func @transform_6(%arg0: i32) -> (i32, i32) {
    %c0_i32 = arith.constant 0 : i32
    %c0_i32_0 = arith.constant 0 : i32
    %c0_i32_1 = arith.constant 0 : i32
    return %c0_i32, %c0_i32_0 : i32, i32
  }
  func.func @transform_7(%arg0: i32) -> (i32, i32) {
    %c0_i32 = arith.constant 0 : i32
    %c0_i32_0 = arith.constant 0 : i32
    return %c0_i32, %arg0 : i32, i32
  }
}

</mosaic_0001>

<bundles_post_ra>
// kernel: dnn_forward_t.1
= control target key start
LH: loop header
LB: loop body
LE: loop exit
PB: predicated region body
PF: predicated region fallthrough
CT: control target
= control target key end

     0   :  { %s898_s26 = smov 0   ;;  %s1004_s0 = inlined_call_operand.vmem [shape: f32[2,512], index: 0, kind: input, shape index: {}]   ;;  %s1005_s1 = inlined_call_operand.vmem [shape: f32[40,2], index: 1, kind: input, shape index: {}]   ;;  %s1006_s2 = inlined_call_operand.vmem [shape: f32[40,1], index: 2, kind: input, shape index: {}]   ;;  %s1007_s3 = inlined_call_operand.vmem [shape: f32[40,40], index: 3, kind: input, shape index: {}]   ;;  %s1008_s4 = inlined_call_operand.vmem [shape: f32[40,1], index: 4, kind: input, shape index: {}]   ;;  %s1009_s5 = inlined_call_operand.vmem [shape: f32[1,40], index: 5, kind: input, shape index: {}]   ;;  %s1010_s6 = inlined_call_operand.<no memory space> [shape: f32[1,1], index: 6, kind: input, shape index: {}]   ;;  %s1011_s7 = inlined_call_operand.vmem [shape: f32[1,512], index: 7, kind: output, shape index: {}]  }
   0x1   :  { %v12_v0 = vstv %s1010_s6 }
   0x2   :  { %13 = vst [vmem:[#allocation2] sm:$0x1] %v12_v0 }
   0x3 LB: > { %s767_s27 = sadd.s32 4294967295, %s850_s26   ;;  %p771_p0 = scmp.ge.s32.totalorder %s850_s26, 1  ;;  %s850_s26 = sphi %s898_s26, %s19_s26  }
   0x4   : > { %p240_p1 = scmp.lt.s32.totalorder %s850_s26, 3 }
   0x6   : > { %p241_p2 = pnand %p771_p0, %p240_p1 }
   0x7   : > { %s772_s28 = sshll.u32 (!%p241_p2), %s767_s27, 1 }
   0x8   : > { %244 = sbr.rel (%p241_p2) target bundleno = 700 (0x2bc), region = 48  ;;  %p272_p3 = scmp.lt.s32.totalorder (!%p241_p2), %s772_s28, 3 }
   0xd   : > { %v852_v1 = vmov 0.0   ;;  %v853_v2 = vmov 0   ;;  %v292_v3 = vld [vmem:[%s1006_s2 + $0x20] sm:$0xff]  ;;  %v290_v4 = vld [vmem:[%s1006_s2 + $0x10] sm:$0xff]  ;;  %s1013_s28 = smov (!%p272_p3, %s772_s28), 3  ;;  %v291_v5 = vld [vmem:[%s1006_s2 + $0x18] sm:$0xff] }
   0xe   : > { %412 = vmatprep.mubr.f32.mxu0 %v852_v1  ;;  %568 = vmatprep.mubr.f32.mxu1 %v852_v1  ;;  %v289_v6 = vld [vmem:[%s1006_s2 + $0x8] sm:$0xff]  ;;  %s773_s13 = sshll.u32 %s1013_s28, 1  ;;  %vm343_vm0 = vcmask 1041408   ;;  %v288_v9 = vld [vmem:[%s1006_s2] sm:$0xff]  ;;  %vm327_vm1 = vcmask 15360   ;;  %v461_v12 = vld [vmem:[%s1008_s4 + $0x18] sm:$0xff]  ;;  %s280_s9 = scalar_lea.vmem %s1011_s7, %s1013_s28 }
   0xf   : > { %802 = vset.pattern.permute.xlu0 %v853_v2  ;;  %803 = vset.pattern.permute.xlu1 %v853_v2  ;;  %s275_s16 = scalar_lea.vmem %s1004_s0, %s773_s13  ;;  %v283_v10 = vld [vmem:[%s1005_s1] sm:$0xff]  ;;  %v284_v13 = vld [vmem:[%s1005_s1 + $0x8] sm:$0xff]  ;;  %v460_v14 = vld [vmem:[%s1008_s4 + $0x10] sm:$0xff]  ;;  %vm488_vm2 = vcmask 326656  }
  0x10   : > { %315 = vperm.xlu0 %802, %v292_v3   ;;  %305 = vperm.xlu1 %803, %v290_v4   ;;  %v775_v7 = vld.sshfl [vmem:[%s275_s16] sm:$0x33 pattern:$0x76325410]  ;;  %v459_v15 = vld [vmem:[%s1008_s4 + $0x8] sm:$0xff]  ;;  %v285_v16 = vld [vmem:[%s1005_s1 + $0x10] sm:$0xff] }
  0x11   : > { %v326_v8 = vcombine.high %v775_v7, %v775_v7  ;;  %v462_v11 = vld [vmem:[%s1008_s4 + $0x20] sm:$0xff]  ;;  %v286_v19 = vld [vmem:[%s1005_s1 + $0x18] sm:$0xff]  ;;  %v454_v57 = vld [vmem:[%s1007_s3 + $0x8] sm:$0xff] }
  0x12   : > { %v458_v17 = vld [vmem:[%s1008_s4] sm:$0xff]  ;;  %v455_v58 = vld [vmem:[%s1007_s3 + $0x10] sm:$0xff]  ;;  %v456_v59 = vld [vmem:[%s1007_s3 + $0x18] sm:$0xff] }
  0x13   : > { %776 = vmatprep.subr.msk.mxu0 %vm343_vm0, %v326_v8  ;;  %v610_v18 = vld [vmem:[#allocation2] sm:$0x1] }
  0x14   : > { %310 = vperm.xlu0 %802, %v291_v5   ;;  %300 = vperm.xlu1 %803, %v289_v6   ;;  %v287_v20 = vld [vmem:[%s1005_s1 + $0x20] sm:$0xff] }
  0x15   : > { %777 = vmatpush1.msk.msra.mxu0 %vm343_vm0, %v775_v7  ;;  %v453_v55 = vld [vmem:[%s1007_s3] sm:$0xff] }
  0x16   : > { %778 = vmatmul.mubr.msk.f32.vlgmr.msra.gmra.mxu0 %vm327_vm1, %v283_v10  ;;  %v457_v60 = vld [vmem:[%s1007_s3 + $0x20] sm:$0xff] }
  0x17   : > { %418 = vmatprep.mubr.f32.mxu0 %v852_v1 }
  0x18   : > { %295 = vperm.xlu0 %802, %v288_v9   ;;  %485 = vperm.xlu1 %803, %v462_v11  }
  0x1a   : > { %779 = vmatmul.mubr.msk.f32.gmra.mxu0 %vm327_vm1, %v284_v13 }
  0x1b   : > { %424 = vmatprep.mubr.f32.mxu0 %v852_v1 }
  0x1c   : > { %480 = vperm.xlu0 %802, %v461_v12   ;;  %475 = vperm.xlu1 %803, %v460_v14  }
  0x1e   : > { %780 = vmatmul.mubr.msk.f32.gmra.mxu0 %vm327_vm1, %v285_v16 }
  0x1f   : > { %430 = vmatprep.mubr.f32.mxu0 %v852_v1 }
  0x20   : > { %470 = vperm.xlu0 %802, %v459_v15   ;;  %465 = vperm.xlu1 %803, %v458_v17  }
  0x22   : > { %781 = vmatmul.mubr.msk.f32.gmra.mxu0 %vm327_vm1, %v286_v19 }
  0x23   : > { %436 = vmatprep.mubr.f32.mxu0 %v852_v1 }
  0x24   : > { %613 = vperm.xlu0 %802, %v610_v18  }
  0x26   : > { %782 = vmatmul.mubr.msk.f32.gmra.mxu0 %vm327_vm1, %v287_v20 }
  0x27   : > { %687 = vmatprep.mubr.f32.mxu0 %v852_v1 }
  0x8b   : > { %v316_v27 = vpop.permute.xlu0 %315  ;;  %v306_v30 = vpop.permute.xlu1 %305 }
  0x8f   : > { %v311_v32 = vpop.permute.xlu0 %310  ;;  %v301_v38 = vpop.permute.xlu1 %300 }
  0x93   : > { %v296_v41 = vpop.permute.xlu0 %295  ;;  %v486_v4 = vpop.permute.xlu1 %485 }
  0x97   : > { %v481_v7 = vpop.permute.xlu0 %480  ;;  %v476_v9 = vpop.permute.xlu1 %475 }
  0x9b   : > { %v471_v15 = vpop.permute.xlu0 %470  ;;  %v466_v18 = vpop.permute.xlu1 %465 }
  0xd6   : > { %v414_v21 = vpop.f32.mrf.mxu0 }
  0xd7   : > { %v415_v45 = vadd.f32 %v414_v21, %v296_v41 }
  0xd8   : > { %v416_v22 = vpop.f32.mrf.mxu0 }
  0xd9   : > { %v417_v44 = vadd.f32 %v416_v22, %v296_v41 }
  0xda   : > { %v420_v23 = vpop.f32.mrf.mxu0 }
  0xdb   : > { %v421_v43 = vadd.f32 %v420_v23, %v301_v38 }
  0xdc   : > { %v422_v24 = vpop.f32.mrf.mxu0 }
  0xdd   : > { %v423_v42 = vadd.f32 %v422_v24, %v301_v38  ;;  %v614_v38 = vpop.permute.xlu0 %613 }
  0xde   : > { %v426_v25 = vpop.f32.mrf.mxu0 }
  0xdf   : > { %v427_v40 = vadd.f32 %v426_v25, %v306_v30 }
  0xe0   : > { %v428_v26 = vpop.f32.mrf.mxu0 }
  0xe1   : > { %v429_v39 = vadd.f32 %v428_v26, %v306_v30 }
  0xe2   : > { %v432_v28 = vpop.f32.mrf.mxu0 }
  0xe3   : > { %v433_v37 = vadd.f32 %v432_v28, %v311_v32 }
  0xe4   : > { %v434_v29 = vpop.f32.mrf.mxu0 }
  0xe5   : > { %v435_v35 = vadd.f32 %v434_v29, %v311_v32 }
  0xe6   : > { %v438_v31 = vpop.f32.mrf.mxu0 }
  0xe7   : > { %v439_v33 = vadd.f32 %v438_v31, %v316_v27  ;;  %v609_v31 = vld [vmem:[%s1009_s5] sm:$0x1] }
  0xe8   : > { %v440_v34 = vpop.f32.mrf.mxu0 }
  0xe9   : > { %v441_v36 = vadd.f32 %v440_v34, %v316_v27 }
  0xeb   : > { %804 = vtanh.f32 %v441_v36 }
  0xec   : > { %806 = vtanh.f32 %v439_v33  ;;  %v616_v33 = vlaneseq }
  0xed   : > { %808 = vtanh.f32 %v435_v35  ;;  %v854_v35 = vmov 1966171168  }
  0xee   : > { %810 = vtanh.f32 %v433_v37  ;;  %v617_v34 = vshrl.u32 %v616_v33, 7  ;;  %v698_v36 = vunpack.c.l.s4 %v854_v35  ;;  %vm714_vm3 = vcmp.lt.s32.totalorder %v616_v33, 256 }
  0xef   : > { %812 = vtanh.f32 %v429_v39 }
  0xf0   : > { %814 = vtanh.f32 %v427_v40  ;;  %v618_v37 = vsub.s32 0, %v617_v34  ;;  %v699_v39 = vunpack.c.0.s8 %v698_v36 }
  0xf1   : > { %816 = vtanh.f32 %v423_v42 }
  0xf2   : > { %818 = vtanh.f32 %v421_v43  ;;  %v619_v41 = vrot.slane %v614_v38, %v618_v37 }
  0xf3   : > { %820 = vtanh.f32 %v417_v44 }
  0xf4   : > { %822 = vtanh.f32 %v415_v45  ;;  %v702_v45 = vsub.s32 %v699_v39, %v617_v34 }
  0xf8   : > { %v805_v46 = vpop.eup %804 }
  0xf9   : > { %v807_v47 = vpop.eup %806  ;;  %526 = vmatprep.subr.mxu1 %v805_v46 }
  0xfa   : > { %v809_v48 = vpop.eup %808  ;;  %527 = vmatpush1.msra.mxu1 %v807_v47 }
  0xfb   : > { %v811_v49 = vpop.eup %810  ;;  %528 = vmatprep.subr.mxu1 %v809_v48 }
  0xfc   : > { %v813_v50 = vpop.eup %812  ;;  %529 = vmatpush1.msra.mxu1 %v811_v49 }
  0xfd   : > { %v815_v51 = vpop.eup %814  ;;  %530 = vmatprep.subr.mxu1 %v813_v50 }
  0xfe   : > { %v817_v52 = vpop.eup %816  ;;  %531 = vmatpush1.msra.mxu1 %v815_v51 }
  0xff   : > { %v819_v53 = vpop.eup %818  ;;  %532 = vmatprep.subr.mxu1 %v817_v52 }
 0x100   : > { %v821_v54 = vpop.eup %820  ;;  %533 = vmatpush1.msra.mxu1 %v819_v53 }
 0x101   : > { %v823_v56 = vpop.eup %822  ;;  %534 = vmatprep.subr.mxu1 %v821_v54 }
 0x102   : > { %535 = vmatpush1.msra.mxu1 %v823_v56 }
 0x103   : > { %783 = vmatmul.mubr.msk.f32.vlgmr.msra.gmra.mxu1 %vm488_vm2, %v453_v55 }
 0x104   : > { %574 = vmatprep.mubr.f32.mxu1 %v852_v1 }
 0x107   : > { %784 = vmatmul.mubr.msk.f32.gmra.mxu1 %vm488_vm2, %v454_v57 }
 0x108   : > { %580 = vmatprep.mubr.f32.mxu1 %v852_v1 }
 0x10b   : > { %785 = vmatmul.mubr.msk.f32.gmra.mxu1 %vm488_vm2, %v455_v58 }
 0x10c   : > { %586 = vmatprep.mubr.f32.mxu1 %v852_v1 }
 0x10f   : > { %786 = vmatmul.mubr.msk.f32.gmra.mxu1 %vm488_vm2, %v456_v59 }
 0x110   : > { %592 = vmatprep.mubr.f32.mxu1 %v852_v1 }
 0x113   : > { %787 = vmatmul.mubr.msk.f32.gmra.mxu1 %vm488_vm2, %v457_v60 }
 0x1c3   : > { %v570_v61 = vpop.f32.mrf.mxu1 }
 0x1c4   : > { %v571_v21 = vadd.f32 %v570_v61, %v466_v18 }
 0x1c5   : > { %v572_v62 = vpop.f32.mrf.mxu1 }
 0x1c6   : > { %v573_v20 = vadd.f32 %v572_v62, %v466_v18 }
 0x1c7   : > { %v576_v63 = vpop.f32.mrf.mxu1 }
 0x1c8   : > { %v577_v19 = vadd.f32 %v576_v63, %v471_v15 }
 0x1c9   : > { %v578_v0 = vpop.f32.mrf.mxu1 }
 0x1ca   : > { %v579_v17 = vadd.f32 %v578_v0, %v471_v15 }
 0x1cb   : > { %v582_v2 = vpop.f32.mrf.mxu1 }
 0x1cc   : > { %v583_v16 = vadd.f32 %v582_v2, %v476_v9 }
 0x1cd   : > { %v584_v3 = vpop.f32.mrf.mxu1 }
 0x1ce   : > { %v585_v14 = vadd.f32 %v584_v3, %v476_v9 }
 0x1cf   : > { %v588_v5 = vpop.f32.mrf.mxu1 }
 0x1d0   : > { %v589_v13 = vadd.f32 %v588_v5, %v481_v7 }
 0x1d1   : > { %v590_v6 = vpop.f32.mrf.mxu1 }
 0x1d2   : > { %v591_v11 = vadd.f32 %v590_v6, %v481_v7 }
 0x1d3   : > { %v594_v8 = vpop.f32.mrf.mxu1 }
 0x1d4   : > { %v595_v10 = vadd.f32 %v594_v8, %v486_v4 }
 0x1d5   : > { %v596_v1 = vpop.f32.mrf.mxu1 }
 0x1d6   : > { %v597_v12 = vadd.f32 %v596_v1, %v486_v4 }
 0x1d8   : > { %824 = vtanh.f32 %v597_v12 }
 0x1d9   : > { %826 = vtanh.f32 %v595_v10 }
 0x1da   : > { %828 = vtanh.f32 %v591_v11 }
 0x1db   : > { %830 = vtanh.f32 %v589_v13 }
 0x1dc   : > { %832 = vtanh.f32 %v585_v14 }
 0x1dd   : > { %834 = vtanh.f32 %v583_v16 }
 0x1de   : > { %836 = vtanh.f32 %v579_v17 }
 0x1df   : > { %838 = vtanh.f32 %v577_v19 }
 0x1e0   : > { %840 = vtanh.f32 %v573_v20 }
 0x1e1   : > { %842 = vtanh.f32 %v571_v21 }
 0x1e5   : > { %v825_v22 = vpop.eup %824 }
 0x1e6   : > { %v827_v23 = vpop.eup %826  ;;  %645 = vmatprep.subr.mxu0 %v825_v22 }
 0x1e7   : > { %v829_v24 = vpop.eup %828  ;;  %646 = vmatpush1.msra.mxu0 %v827_v23 }
 0x1e8   : > { %v831_v25 = vpop.eup %830  ;;  %647 = vmatprep.subr.mxu0 %v829_v24 }
 0x1e9   : > { %v833_v26 = vpop.eup %832  ;;  %648 = vmatpush1.msra.mxu0 %v831_v25 }
 0x1ea   : > { %v835_v27 = vpop.eup %834  ;;  %649 = vmatprep.subr.mxu0 %v833_v26 }
 0x1eb   : > { %v837_v28 = vpop.eup %836  ;;  %650 = vmatpush1.msra.mxu0 %v835_v27 }
 0x1ec   : > { %v839_v29 = vpop.eup %838  ;;  %651 = vmatprep.subr.mxu0 %v837_v28 }
 0x1ed   : > { %v841_v30 = vpop.eup %840  ;;  %652 = vmatpush1.msra.mxu0 %v839_v29 }
 0x1ee   : > { %v843_v32 = vpop.eup %842  ;;  %653 = vmatprep.subr.mxu0 %v841_v30 }
 0x1ef   : > { %654 = vmatpush1.msra.mxu0 %v843_v32 }
 0x1f0   : > { %788 = vmatmul.mubr.msk.f32.vlgmr.msra.gmra.mxu0 %vm488_vm2, %v609_v31 }
 0x2b0   : > { %v689_v40 = vpop.f32.mrf.mxu0 }
 0x2b1   : > { %v690_v43 = vadd.f32 %v689_v40, %v619_v41 }
 0x2b2   : > { %v691_v42 = vpop.f32.mrf.mxu0 }
 0x2b3   : > { %v692_v44 = vadd.f32 %v691_v42, %v619_v41 }
 0x2b5   : > { %v696_v46 = vcombine.low %v690_v43, %v692_v44 }
 0x2b7   : > { %v703_v47 = vrot.slane %v696_v46, %v702_v45 }
 0x2b9   : > { %v710_v48 = vrot.slane %v703_v47, %v702_v45 }
 0x2bb   : > { %716 = vst.msk [vmem:[%s280_s9] sm:$0x3] %vm714_vm3, %v710_v48 }
 0x2bc PF: > { %s19_s26 = sadd.s32 1, %s850_s26  }
 0x2bd   : > { %p16_p4 = scmp.ge.s32.totalorder %s19_s26, 4  }
 0x2bf   :  { %18 = sbr.rel (!%p16_p4) target bundleno = 3 (0x3), region = 78 }

</bundles_post_ra>
